<compile_context>
chip_gen: v7x
topology: tpu7x:2x2x1
jax: 0.10.0
libtpu: 0.0.40
codegen_flags: <defaults>
</compile_context>

<pallas_src>
import jax
import jax.numpy as jnp
from jax.experimental import pallas as pl
from jax.experimental.pallas import tpu as pltpu


def _round_up(a, b):
    return (a + b - 1) // b * b


def gauss_layer_kernel(x_ref, w_ref, b_ref, o_ref):
    # x_ref : (tm, K)   input row tile
    # w_ref : (K, tn)   column slice of the (scale-folded, transposed) weight
    # b_ref : (1, tn)   scale-folded bias slice (f32)
    # o_ref : (tm, tn)  output tile
    z = jnp.dot(x_ref[...], w_ref[...], preferred_element_type=jnp.float32)
    z = z + b_ref[...]                       # broadcast (1, tn) over rows
    o_ref[...] = jnp.exp(-(z * z)).astype(o_ref.dtype)


def gauss_layer(x, weight, bias, scale, *, tm=256, tn=256,
                param_dtype=None, out_dtype=None):
    """WIRE Gaussian layer: exp(-(scale * (x @ W^T + b))^2).

    x: (..., K) f32; weight: (N, K) (PyTorch nn.Linear layout); bias: (N,).
    param_dtype: dtype for the matmul operands (e.g. jnp.bfloat16 on v6e/v7x).
    out_dtype:   output dtype (defaults to x.dtype).
    """
    orig_shape = x.shape
    K = orig_shape[-1]
    x2d = x.reshape(-1, K)                   # flatten leading dims like nn.Linear
    M = x2d.shape[0]
    N, Kw = weight.shape
    assert Kw == K
    if out_dtype is None:
        out_dtype = x.dtype
    if param_dtype is None:
        param_dtype = x.dtype

    # Fold scale into the affine parameters.
    scale_f = jnp.float32(scale)
    w_t = weight.T.astype(jnp.float32) * scale_f             # (K, N)
    b_row = (bias.astype(jnp.float32) * scale_f).reshape(1, N)

    # Pad to hardware-friendly sizes (lane = 128, sublane = 8); zero padding
    # keeps real outputs exact, padded rows/cols are sliced off below.
    K_pad = _round_up(K, 128)
    N_pad = _round_up(N, 128)
    tm = _round_up(max(8, min(tm, _round_up(M, 8))), 8)
    M_pad = _round_up(M, tm)
    tn = _round_up(max(128, min(tn, N_pad)), 128)
    N_pad = _round_up(N_pad, tn)

    x_p = jnp.zeros((M_pad, K_pad), jnp.float32).at[:M, :K].set(
        x2d.astype(jnp.float32)).astype(param_dtype)
    w_p = jnp.zeros((K_pad, N_pad), jnp.float32).at[:K, :N].set(
        w_t).astype(param_dtype)
    b_p = jnp.zeros((1, N_pad), jnp.float32).at[:, :N].set(b_row)

    grid = (M_pad // tm, N_pad // tn)

    # Scoped VMEM budget: double-buffered x / w / bias / out tiles, capped so
    # it stays safe on v7x's 64 MiB physical VMEM.
    p_item = jnp.dtype(param_dtype).itemsize
    o_item = jnp.dtype(out_dtype).itemsize
    tile_bytes = 2 * (tm * K_pad * p_item      # x tiles
                      + K_pad * tn * p_item    # weight tiles
                      + tn * 4                 # bias tiles
                      + tm * tn * o_item)      # output tiles
    vmem_limit = int(min(64 * 1024 * 1024, max(32 * 1024 * 1024, 2 * tile_bytes)))

    cost = pl.CostEstimate(
        flops=2 * M_pad * K_pad * N_pad,
        transcendentals=M_pad * N_pad,
        bytes_accessed=(M_pad * K_pad * p_item
                        + K_pad * N_pad * p_item
                        + N_pad * 4
                        + M_pad * N_pad * o_item),
    )

    out_p = pl.pallas_call(
        gauss_layer_kernel,
        out_shape=jax.ShapeDtypeStruct((M_pad, N_pad), out_dtype),
        grid_spec=pltpu.PrefetchScalarGridSpec(
            num_scalar_prefetch=0,
            grid=grid,
            in_specs=[
                pl.BlockSpec((tm, K_pad), lambda i, j: (i, 0)),   # x row tile
                pl.BlockSpec((K_pad, tn), lambda i, j: (0, j)),   # W^T col tile
                pl.BlockSpec((1, tn), lambda i, j: (0, j)),       # bias slice
            ],
            out_specs=pl.BlockSpec((tm, tn), lambda i, j: (i, j)),
        ),
        compiler_params=pltpu.CompilerParams(
            dimension_semantics=("parallel", "parallel"),
            vmem_limit_bytes=vmem_limit,
        ),
        cost_estimate=cost,
    )(x_p, w_p, b_p)

    out = out_p[:M, :N]
    return out.reshape(orig_shape[:-1] + (N,))


def gauss_layer_ref(x, weight, bias, scale):
    z = x @ weight.T + bias
    return jnp.exp(-(scale * z) ** 2)


if __name__ == "__main__":
    key = jax.random.PRNGKey(0)
    k_x, k_w, k_b = jax.random.split(key, 3)

    batch = 16
    in_features = 32
    out_features = 64
    scale = 10.0

    # Deterministic "init": mimic nn.Linear's U(-1/sqrt(in), 1/sqrt(in)) range.
    bound = 1.0 / (in_features ** 0.5)
    x = jax.random.normal(k_x, (batch, in_features), dtype=jnp.float32)
    weight = jax.random.uniform(k_w, (out_features, in_features),
                                minval=-bound, maxval=bound, dtype=jnp.float32)
    bias = jax.random.uniform(k_b, (out_features,),
                              minval=-bound, maxval=bound, dtype=jnp.float32)

    ref = gauss_layer_ref(x, weight, bias, scale)

    # f32 path: strict check against the reference.
    out = gauss_layer(x, weight, bias, scale)
    out = jax.block_until_ready(out)
    assert out.shape == (batch, out_features)
    assert jnp.allclose(out, ref, atol=1e-5, rtol=1e-5), "f32 mismatch vs reference"

    # bf16-operand path (v6e/v7x MXU-friendly), f32 accumulation: looser check.
    out_bf16 = gauss_layer(x, weight, bias, scale, param_dtype=jnp.bfloat16)
    out_bf16 = jax.block_until_ready(out_bf16)
    assert jnp.allclose(out_bf16, ref, atol=5e-2, rtol=5e-2), "bf16 mismatch vs reference"

    # Leading-dims path (like nn.Linear on (B, S, K) input).
    x3d = x.reshape(4, 4, in_features)
    out3d = jax.block_until_ready(gauss_layer(x3d, weight, bias, scale))
    assert out3d.shape == (4, 4, out_features)
    assert jnp.allclose(out3d.reshape(batch, out_features), ref,
                        atol=1e-5, rtol=1e-5), "3-D input mismatch vs reference"

    print("KERNEL_OK")
</pallas_src>

<mosaic_0001>
module attributes {stable_mosaic.version = 11 : i64} {
  func.func @gauss_layer_kernel(%arg0: i32, %arg1: i32, %arg2: memref<16x128xf32, #tpu.memory_space<vmem>>, %arg3: memref<128x128xf32, #tpu.memory_space<vmem>>, %arg4: memref<1x128xf32, #tpu.memory_space<vmem>>, %arg5: memref<16x128xf32, #tpu.memory_space<vmem>>) attributes {dimension_semantics = [#tpu.dimension_semantics<parallel>, #tpu.dimension_semantics<parallel>], iteration_bounds = array<i64: 1, 1>, scalar_prefetch = 0 : i64, scratch_operands = 0 : i64, tpu.core_type = #tpu.core_type<tc>, window_params = [{transform_indices = @transform_0, window_bounds = array<i64: 16, 128>}, {transform_indices = @transform_1, window_bounds = array<i64: 128, 128>}, {transform_indices = @transform_2, window_bounds = array<i64: 1, 128>}, {transform_indices = @transform_3, window_bounds = array<i64: 16, 128>}]} {
    %c0 = arith.constant 0 : index
    %c0_0 = arith.constant 0 : index
    %0 = vector.load %arg2[%c0, %c0_0] : memref<16x128xf32, #tpu.memory_space<vmem>>, vector<16x128xf32>
    %c0_1 = arith.constant 0 : index
    %c0_2 = arith.constant 0 : index
    %1 = vector.load %arg3[%c0_1, %c0_2] : memref<128x128xf32, #tpu.memory_space<vmem>>, vector<128x128xf32>
    %cst = arith.constant dense<0.000000e+00> : vector<16x128xf32>
    %2 = tpu.matmul %0, %1, %cst {dimension_numbers = #tpu.dot_dimension_numbers<[1], [0], [0], [1], [0, 0, 1, 1], [], []>} : vector<16x128xf32>, vector<128x128xf32>, vector<16x128xf32> -> vector<16x128xf32>
    %c0_3 = arith.constant 0 : index
    %c0_4 = arith.constant 0 : index
    %3 = vector.load %arg4[%c0_3, %c0_4] : memref<1x128xf32, #tpu.memory_space<vmem>>, vector<1x128xf32>
    %4 = vector.broadcast %3 : vector<1x128xf32> to vector<16x128xf32>
    %5 = arith.addf %2, %4 : vector<16x128xf32>
    %6 = arith.mulf %5, %5 : vector<16x128xf32>
    %cst_5 = arith.constant 0.000000e+00 : f32
    %7 = vector.broadcast %cst_5 : f32 to vector<16x128xf32>
    %8 = arith.subf %7, %6 : vector<16x128xf32>
    %9 = math.exp %8 : vector<16x128xf32>
    %c0_6 = arith.constant 0 : index
    %c0_7 = arith.constant 0 : index
    %10 = vector.load %arg5[%c0_6, %c0_7] : memref<16x128xf32, #tpu.memory_space<vmem>>, vector<16x128xf32>
    tpu.vector_store %arg5[%c0_6, %c0_7], %9 {strides = array<i32>} : memref<16x128xf32, #tpu.memory_space<vmem>>, vector<16x128xf32>,
    return
  }
  func.func @transform_0(%arg0: i32, %arg1: i32) -> (i32, i32) {
    %c0_i32 = arith.constant 0 : i32
    %c0_i32_0 = arith.constant 0 : i32
    return %arg0, %c0_i32 : i32, i32
  }
  func.func @transform_1(%arg0: i32, %arg1: i32) -> (i32, i32) {
    %c0_i32 = arith.constant 0 : i32
    %c0_i32_0 = arith.constant 0 : i32
    return %c0_i32, %arg1 : i32, i32
  }
  func.func @transform_2(%arg0: i32, %arg1: i32) -> (i32, i32) {
    %c0_i32 = arith.constant 0 : i32
    %c0_i32_0 = arith.constant 0 : i32
    return %c0_i32, %arg1 : i32, i32
  }
  func.func @transform_3(%arg0: i32, %arg1: i32) -> (i32, i32) {
    %c0_i32 = arith.constant 0 : i32
    return %arg0, %arg1 : i32, i32
  }
}

</mosaic_0001>

<bundles_post_ra>
// kernel: tpu_custom_call.1
= control target key start
LH: loop header
LB: loop body
LE: loop exit
PB: predicated region body
PF: predicated region fallthrough
CT: control target
= control target key end

     0   :  { %8 = vsyncpa [#allocation3], 0  ;;  %s411_s0 = inlined_call_operand.hbm [shape: f32[16,128], index: 0, kind: input, shape index: {}]   ;;  %s412_s1 = inlined_call_operand.hbm [shape: f32[128,128], index: 1, kind: input, shape index: {}]   ;;  %s413_s2 = inlined_call_operand.vmem [shape: f32[1,128], index: 2, kind: input, shape index: {}]   ;;  %s414_s3 = inlined_call_operand.hbm [shape: f32[16,128], index: 3, kind: output, shape index: {}]  }
   0x1   :  { %9 = vsyncpa [#allocation6], 0 }
   0x2   :  { %10 = vsyncpa [#allocation4], 0  ;;  %s338_s12 = smov [#allocation2]   ;;  %s266_s16 = scalar_lea.hbm %s411_s0, 256 }
   0x3   :  { %s16_s13 = sshll.u32 %s338_s12, 4  ;;  %p267_p0 = scmp.ne.s32.totalorder %s411_s0, %s266_s16  ;;  %s17_s13 = int_to_ptr.vmem [resolvable:$true] %s16_s13 }
   0x4   :  { %p270_p1 = scmp.lt.u32.totalorder %s266_s16, %s411_s0 }
   0x6   :  { %p272_p2 = pnand %p270_p1, %p267_p0 }
   0x8   :  { %275 = shalt.err (!%p272_p2)
}
   0x9   :  { %s276_s21 = scalar_lea.vmem %s17_s13, 256  ;;  %p281_p4 = scmp.lt.s32.totalorder %s17_s13, %s17_s13 }
   0xa   :  { %p277_p3 = scmp.ne.s32.totalorder %s17_s13, %s276_s21  ;;  %p282_p5 = scmp.lt.s32.totalorder %s276_s21, %s276_s21 }
   0xc   :  { %p283_p6 = por %p282_p5, %p281_p4 }
   0xe   :  { %p284_p7 = pnand %p283_p6, %p277_p3 }
  0x10   :  { %287 = shalt.err (!%p284_p7)
}
  0x11   :  { %s339_s22 = smov 128   ;;  %s340_s23 = smov 8  }
  0x12   :  { %22 = dma.hbm_to_vmem [thread:$0]  %s411_s0, 256, %s17_s13, [#allocation3], %s339_s22, %s339_s22, %s340_s23  }
  0x13   :  { %s341_s26 = smov [#allocation5]   ;;  %s288_s30 = scalar_lea.hbm %s412_s1, 2048 }
  0x14   :  { %s28_s27 = sshll.u32 %s341_s26, 4  ;;  %p289_p8 = scmp.ne.s32.totalorder %s412_s1, %s288_s30  ;;  %s29_s27 = int_to_ptr.vmem [resolvable:$true] %s28_s27 }
  0x15   :  { %p292_p9 = scmp.lt.u32.totalorder %s288_s30, %s412_s1 }
  0x17   :  { %p294_p10 = pnand %p292_p9, %p289_p8 }
  0x19   :  { %297 = shalt.err (!%p294_p10)
}
  0x1a   :  { %s298_s8 = scalar_lea.vmem %s29_s27, 2048  ;;  %p303_p12 = scmp.lt.s32.totalorder %s29_s27, %s29_s27 }
  0x1b   :  { %p299_p11 = scmp.ne.s32.totalorder %s29_s27, %s298_s8  ;;  %p304_p13 = scmp.lt.s32.totalorder %s298_s8, %s298_s8 }
  0x1d   :  { %p305_p0 = por %p304_p13, %p303_p12 }
  0x1f   :  { %p306_p1 = pnand %p305_p0, %p299_p11 }
  0x21   :  { %309 = shalt.err (!%p306_p1)
}
  0x22   :  { %34 = dma.hbm_to_vmem [thread:$0]  %s412_s1, 2048, %s29_s27, [#allocation6], %s339_s22, %s339_s22, %s340_s23  }
  0x23   :  { %332 = dma.done.wait [#allocation3], 256  }
  0x24   :  { %333 = vsyncadd [#allocation3], 4294967040 }
  0x25   :  { %334 = dma.done.wait [#allocation6], 2048  }
  0x26   :  { %335 = vsyncadd [#allocation6], 4294965248  ;;  %v45_v0 = vld [vmem:[#allocation5] sm:$0xff]  ;;  %v46_v1 = vld [vmem:[#allocation5 + $0x8] sm:$0xff]  ;;  %s342_s11 = smov [#allocation7]  }
  0x27   :  { %v47_v2 = vld [vmem:[#allocation5 + $0x10] sm:$0xff]  ;;  %v225_v3 = vpack.c.bf16 %v46_v1, %v45_v0  ;;  %v48_v4 = vld [vmem:[#allocation5 + $0x18] sm:$0xff]  ;;  %v49_v6 = vld [vmem:[#allocation5 + $0x20] sm:$0xff]  ;;  %s158_s12 = sshll.u32 %s342_s11, 4  ;;  %s159_s12 = int_to_ptr.vmem [resolvable:$true] %s158_s12 }
  0x28   :  { %v229_v5 = vpack.c.bf16 %v48_v4, %v47_v2  ;;  %v50_v7 = vld [vmem:[#allocation5 + $0x28] sm:$0xff]  ;;  %v43_v9 = vld [vmem:[#allocation2] sm:$0xff]  ;;  %v52_v11 = vld [vmem:[#allocation5 + $0x38] sm:$0xff]  ;;  %p315_p3 = scmp.lt.s32.totalorder %s159_s12, %s159_s12 }
  0x29   :  { %226 = vmatprep.subr.bf16.mxu0 %v225_v3  ;;  %v233_v8 = vpack.c.bf16 %v50_v7, %v49_v6  ;;  %v51_v10 = vld [vmem:[#allocation5 + $0x30] sm:$0xff]  ;;  %222 = vmatprep.mubr.f32.mxu0 %v43_v9  ;;  %v53_v13 = vld [vmem:[#allocation5 + $0x40] sm:$0xff]  ;;  %v54_v14 = vld [vmem:[#allocation5 + $0x48] sm:$0xff] }
  0x2a   :  { %228 = vmatpush3.bf16.msra.mxu0 %v225_v3  ;;  %v237_v12 = vpack.c.bf16 %v52_v11, %v51_v10  ;;  %v241_v15 = vpack.c.bf16 %v54_v14, %v53_v13  ;;  %v55_v16 = vld [vmem:[#allocation5 + $0x50] sm:$0xff]  ;;  %v56_v17 = vld [vmem:[#allocation5 + $0x58] sm:$0xff]  ;;  %v57_v19 = vld [vmem:[#allocation5 + $0x60] sm:$0xff] }
  0x2b   :  { %230 = vmatprep.subr.bf16.mxu0 %v229_v5  ;;  %v245_v18 = vpack.c.bf16 %v56_v17, %v55_v16  ;;  %v58_v20 = vld [vmem:[#allocation5 + $0x68] sm:$0xff]  ;;  %v59_v22 = vld [vmem:[#allocation5 + $0x70] sm:$0xff]  ;;  %v60_v23 = vld [vmem:[#allocation5 + $0x78] sm:$0xff] }
  0x2c   :  { %v249_v21 = vpack.c.bf16 %v58_v20, %v57_v19  ;;  %v253_v24 = vpack.c.bf16 %v60_v23, %v59_v22  ;;  %v44_v25 = vld [vmem:[#allocation2 + $0x8] sm:$0xff]  ;;  %v171_v26 = vld [vmem:[%s413_s2] ss:$0 sm:$0xff]  ;;  %s310_s2 = scalar_lea.vmem %s159_s12, 256 }
  0x2d   :  { %p311_p2 = scmp.ne.s32.totalorder %s159_s12, %s310_s2  ;;  %p316_p4 = scmp.lt.s32.totalorder %s310_s2, %s310_s2 }
  0x2e   :  { %232 = vmatpush3.bf16.msra.mxu0 %v229_v5 }
  0x2f   :  { %234 = vmatprep.subr.bf16.mxu0 %v233_v8  ;;  %p317_p5 = por %p316_p4, %p315_p3 }
  0x31   :  { %p318_p6 = pnand %p317_p5, %p311_p2 }
  0x32   :  { %236 = vmatpush3.bf16.msra.mxu0 %v233_v8 }
  0x33   :  { %238 = vmatprep.subr.bf16.mxu0 %v237_v12 }
  0x36   :  { %240 = vmatpush3.bf16.msra.mxu0 %v237_v12 }
  0x37   :  { %242 = vmatprep.subr.bf16.mxu0 %v241_v15 }
  0x3a   :  { %244 = vmatpush3.bf16.msra.mxu0 %v241_v15 }
  0x3b   :  { %246 = vmatprep.subr.bf16.mxu0 %v245_v18 }
  0x3e   :  { %248 = vmatpush3.bf16.msra.mxu0 %v245_v18 }
  0x3f   :  { %250 = vmatprep.subr.bf16.mxu0 %v249_v21 }
  0x42   :  { %252 = vmatpush3.bf16.msra.mxu0 %v249_v21 }
  0x43   :  { %254 = vmatprep.subr.bf16.mxu0 %v253_v24 }
  0x46   :  { %256 = vmatpush3.bf16.msra.mxu0 %v253_v24 }
  0x49   :  { %223 = vmatmul.mubr.f32.vlgmr.msra.gmra.mrb[0].mxu0 %v44_v25 }
 0x11c   :  { %v224_v27 = vpop.f32.mrb[0].mxu0 }
 0x11d   :  { %v140_v28 = vadd.f32 %v224_v27, %v171_v26  ;;  %v134_v29 = vpop.f32.mrb[1].mxu0 }
 0x11e   :  { %v135_v30 = vadd.f32 %v171_v26, %v134_v29 }
 0x11f   :  { %v144_v31 = vmul.f32 %v140_v28, %v140_v28 }
 0x120   :  { %v143_v32 = vmul.f32 %v135_v30, %v135_v30 }
 0x121   :  { %v146_v33 = vsub.f32 0.0, %v144_v31 }
 0x122   :  { %v145_v34 = vsub.f32 0.0, %v143_v32 }
 0x123   :  { %v149_v35 = vmul.f32 1.442695, %v146_v33 }
 0x124   :  { %v147_v36 = vmul.f32 1.442695, %v145_v34 }
 0x125   :  { %262 = vpow2.f32 %v149_v35 }
 0x126   :  { %264 = vpow2.f32 %v147_v36 }
 0x12f   :  { %v263_v37 = vpop.eup %262 }
 0x130   :  { %v265_v38 = vpop.eup %264  ;;  %152 = vst [vmem:[#allocation7 + $0x8] sm:$0xff] %v263_v37 }
 0x131   :  { %151 = vst [vmem:[#allocation7] sm:$0xff] %v265_v38 }
 0x132   :  { %321 = shalt.err (!%p318_p6)
}
 0x133   :  { %s322_s15 = scalar_lea.hbm %s414_s3, 256 }
 0x134   :  { %p323_p7 = scmp.ne.s32.totalorder %s414_s3, %s322_s15  ;;  %p326_p8 = scmp.lt.u32.totalorder %s322_s15, %s414_s3 }
 0x136   :  { %p328_p9 = pnand %p326_p8, %p323_p7 }
 0x138   :  { %331 = shalt.err (!%p328_p9)
}
 0x139   :  { %164 = dma.vmem_to_hbm [thread:$0]  %s159_s12, 256, %s414_s3, [#allocation4], %s339_s22, %s339_s22, %s340_s23  }
 0x13a   :  { %336 = dma.done.wait [#allocation4], 256  }
 0x13b   :  { %337 = vsyncadd [#allocation4], 4294967040 }
 0x13c   :  { %168 = vsyncpa [#allocation3], 1 }
 0x13d   :  { %169 = vsyncpa [#allocation6], 1 }
 0x13e   :  { %170 = vsyncpa [#allocation4], 1 }

</bundles_post_ra>
